<compile_context>
chip_gen: v7x
topology: tpu7x:2x2x1
jax: 0.10.0
libtpu: 0.0.40
codegen_flags: <defaults>
</compile_context>

<pallas_src>
import jax
import jax.numpy as jnp
from jax.experimental import pallas as pl
from jax.experimental.pallas import tpu as pltpu


def _round_up(x, m):
    return ((x + m - 1) // m) * m


# ----------------------------------------------------------------------------
# Pallas kernel: fused (gathered-features @ scale-folded-weight) + bias, ReLU.
# ----------------------------------------------------------------------------
def _conv_bn_relu_kernel(g_ref, w_ref, bias_ref, o_ref):
    # g_ref:    (TN, K*Cin)   bf16 gathered neighbor features (one tile of points)
    # w_ref:    (K*Cin, Cout) bf16 flattened sparse-conv weight with BN scale pre-folded
    # bias_ref: (1, Cout)     f32 folded BN bias = beta - mean * gamma / sqrt(var + eps)
    # o_ref:    (TN, Cout)    f32 output (real Cout, no lane padding -> minimal HBM writeback)
    acc = jnp.dot(g_ref[...], w_ref[...], preferred_element_type=jnp.float32)
    o_ref[...] = jnp.maximum(acc + bias_ref[...], 0.0).astype(o_ref.dtype)


def conv_bn_relu_pallas(gathered, weight_flat, bias, *, tile_n):
    n_pad, kcin = gathered.shape
    cout = weight_flat.shape[1]
    assert n_pad % tile_n == 0, "wrapper pads N to a multiple of tile_n"
    grid = (n_pad // tile_n,)
    # VMEM/step at tile_n=1024, Cin=4: 2 x 216 KiB bf16 in + ~2 KiB weight + 2 x 32 KiB f32 out
    # (~0.5 MiB).  At realistic SPVNAS channels (Cin=Cout=64): ~7.5 MiB — still under the 32 MiB
    # scoped default; re-derive / set vmem_limit_bytes and cap tile_n (~1024) on v7x's 64 MiB
    # if channel counts grow further.
    return pl.pallas_call(
        _conv_bn_relu_kernel,
        out_shape=jax.ShapeDtypeStruct((n_pad, cout), jnp.float32),
        grid=grid,
        in_specs=[
            # Full last dim (K*Cin) -> contiguous DMA per tile, no padding traffic.
            pl.BlockSpec((tile_n, kcin), lambda i: (i, 0)),
            # Weight / bias: same block every step -> fetched once, resident.
            pl.BlockSpec((kcin, cout), lambda i: (0, 0)),
            pl.BlockSpec((1, cout), lambda i: (0, 0)),
        ],
        # Full last dim (real Cout) -> no padded f32 writeback.
        out_specs=pl.BlockSpec((tile_n, cout), lambda i: (i, 0)),
        compiler_params=pltpu.CompilerParams(dimension_semantics=("parallel",)),
    )(gathered, weight_flat, bias)


# ----------------------------------------------------------------------------
# Kernel map (neighbor lookup) via sorted linearized coords + searchsorted.
# ----------------------------------------------------------------------------
def _kernel_offsets(ks, dilation):
    r = ks // 2
    return (
        jnp.array(
            [
                [dx, dy, dz]
                for dx in range(-r, r + 1)
                for dy in range(-r, r + 1)
                for dz in range(-r, r + 1)
            ],
            dtype=jnp.int32,
        )
        * dilation
    )


def build_neighbor_index(coords, ks=3, dilation=1):
    """coords: [N, 4] int32 as (batch, x, y, z), unique per batch, non-negative, N >= 1.

    Returns nbr: [N, K] int32 where nbr[i, k] is the row index of the neighbor of point i at
    kernel offset k, or N if that voxel is empty (caller appends a zero feature row at index N).
    Offset ordering: (dx, dy, dz) lexicographic over range(-(ks//2), ks//2 + 1).
    """
    n = coords.shape[0]
    offsets = _kernel_offsets(ks, dilation)               # [K, 3]
    shift = (ks // 2) * dilation
    b = coords[:, 0].astype(jnp.int32)
    xyz = coords[:, 1:].astype(jnp.int32)

    # Per-axis extents keep the key range as tight as possible.
    # TODO(synk): keys are int32; for very large voxel extents / many batches the linearized
    # key can overflow — switch to int64 keys (x64) or a two-level lexicographic match there.
    dx_ = jnp.max(xyz[:, 0]) + 2 * shift + 1
    dy_ = jnp.max(xyz[:, 1]) + 2 * shift + 1
    dz_ = jnp.max(xyz[:, 2]) + 2 * shift + 1

    def lin(bb, x, y, z):
        return ((bb * dx_ + (x + shift)) * dy_ + (y + shift)) * dz_ + (z + shift)

    keys = lin(b, xyz[:, 0], xyz[:, 1], xyz[:, 2])        # [N]
    order = jnp.argsort(keys)
    keys_sorted = keys[order]

    tgt = xyz[:, None, :] + offsets[None, :, :]           # [N, K, 3]
    tgt_keys = lin(b[:, None], tgt[..., 0], tgt[..., 1], tgt[..., 2])  # [N, K]
    pos = jnp.clip(jnp.searchsorted(keys_sorted, tgt_keys), 0, n - 1)
    found = keys_sorted[pos] == tgt_keys
    return jnp.where(found, order[pos], n).astype(jnp.int32)


# ----------------------------------------------------------------------------
# Module-equivalent wrapper.
# ----------------------------------------------------------------------------
def basic_convolution_block(feats, coords, params, *, ks=3, dilation=1, tile_n=1024):
    """Equivalent of BasicConvolutionBlock(inc, outc, ks=3, stride=1, dilation=1) forward."""
    w = params["conv_weight"]            # [K, Cin, Cout]  (torchsparse layout)
    gamma = params["bn_gamma"]           # [Cout]
    beta = params["bn_beta"]             # [Cout]
    mean = params["bn_mean"]             # [Cout]
    var = params["bn_var"]               # [Cout]
    eps = 1e-5

    k, cin, cout = w.shape
    n = feats.shape[0]
    kcin = k * cin

    if n == 0:  # empty point cloud guard
        return jnp.zeros((0, cout), jnp.float32)

    # Clamp tile_n for small inputs (sublane granule 8); sweep 512-2048 for large N.
    # On v7x prefer tile_n such that n_pad // tile_n >= ~8 so the parallel axis shards
    # evenly across the 2 TensorCores.
    tile_n = max(8, min(tile_n, _round_up(n, 8)))

    # Kernel map + bf16 im2col gather (zeros where the neighbor voxel is empty).
    nbr = build_neighbor_index(coords, ks=ks, dilation=dilation)             # [N, K]
    feats_z = jnp.concatenate(
        [feats.astype(jnp.bfloat16), jnp.zeros((1, cin), jnp.bfloat16)], axis=0
    )                                                                        # [N+1, Cin] bf16
    gathered = feats_z[nbr].reshape(n, kcin)                                 # [N, K*Cin] bf16

    # Pad only N (ragged) to a multiple of tile_n; K*Cin and Cout stay unpadded
    # (full-dim blocks -> contiguous DMAs, minimal HBM traffic).
    n_pad = _round_up(n, tile_n)
    gathered_p = jnp.pad(gathered, ((0, n_pad - n), (0, 0)))

    # Fold BN scale into the weight; keep only +bias and ReLU in the kernel epilogue.
    scale = gamma.astype(jnp.float32) / jnp.sqrt(var.astype(jnp.float32) + eps)   # [Cout]
    bias = beta.astype(jnp.float32) - mean.astype(jnp.float32) * scale            # [Cout]
    w_flat = w.reshape(kcin, cout).astype(jnp.float32) * scale[None, :]
    w_flat = w_flat.astype(jnp.bfloat16)
    bias2d = bias.reshape(1, cout)

    out_p = conv_bn_relu_pallas(gathered_p, w_flat, bias2d, tile_n=tile_n)
    return out_p[:n]

    # TODO(synk): BatchNorm is applied in inference mode (running stats folded into
    # scale/bias); training-mode batch statistics are not reproduced here.


# ----------------------------------------------------------------------------
# Pure-JAX reference: all-pairs neighbor match, full f32 math (independent check).
# ----------------------------------------------------------------------------
def _reference_gather_all_pairs(feats, coords, ks=3, dilation=1):
    n, cin = feats.shape
    offsets = _kernel_offsets(ks, dilation)
    batch = coords[:, 0]
    xyz = coords[:, 1:]

    def gather_one_offset(off):
        target = xyz + off[None, :]
        eq = (target[:, None, :] == xyz[None, :, :]).all(-1)
        eq = eq & (batch[:, None] == batch[None, :])
        found = eq.any(axis=-1)
        idx = jnp.argmax(eq, axis=-1)
        return jnp.where(found[:, None], feats[idx], 0.0)

    gathered = jax.vmap(gather_one_offset)(offsets)        # [K, N, Cin]
    gathered = jnp.transpose(gathered, (1, 0, 2))          # [N, K, Cin]
    return gathered.reshape(n, offsets.shape[0] * cin)


def reference(feats, coords, params, *, ks=3, dilation=1):
    w = params["conv_weight"]
    k, cin, cout = w.shape
    gathered = _reference_gather_all_pairs(feats, coords, ks=ks, dilation=dilation)
    out = gathered @ w.reshape(k * cin, cout)
    eps = 1e-5
    scale = params["bn_gamma"] / jnp.sqrt(params["bn_var"] + eps)
    bias = params["bn_beta"] - params["bn_mean"] * scale
    return jnp.maximum(out * scale[None, :] + bias[None, :], 0.0)


if __name__ == "__main__":
    key = jax.random.PRNGKey(0)
    k_feat, k_coord, k_w, k_g, k_b, k_m, k_v = jax.random.split(key, 7)

    N, CIN, COUT, KS = 64, 4, 8, 3
    K = KS ** 3

    # Deterministic sparse voxels: N unique coords inside an 8x8x8 grid, batch 0.
    flat = jax.random.permutation(k_coord, jnp.arange(8 * 8 * 8, dtype=jnp.int32))[:N]
    x = flat // 64
    y = (flat // 8) % 8
    z = flat % 8
    coords = jnp.stack([jnp.zeros_like(flat), x, y, z], axis=1)      # [N, 4] (b, x, y, z)

    feats = jax.random.normal(k_feat, (N, CIN), dtype=jnp.float32)   # [N, Cin]

    params = {
        "conv_weight": 0.1 * jax.random.normal(k_w, (K, CIN, COUT), dtype=jnp.float32),
        "bn_gamma": 1.0 + 0.1 * jax.random.normal(k_g, (COUT,), dtype=jnp.float32),
        "bn_beta": 0.1 * jax.random.normal(k_b, (COUT,), dtype=jnp.float32),
        "bn_mean": 0.1 * jax.random.normal(k_m, (COUT,), dtype=jnp.float32),
        "bn_var": jnp.abs(jax.random.normal(k_v, (COUT,), dtype=jnp.float32)) + 0.5,
    }

    out = basic_convolution_block(feats, coords, params, ks=KS, dilation=1)
    out = jax.block_until_ready(out)

    ref = reference(feats, coords, params, ks=KS, dilation=1)
    assert out.shape == (N, COUT)
    # Kernel inputs (gathered feats + scale-folded weight) are bf16 with f32 accumulation,
    # so compare with a bf16-appropriate tolerance.
    assert jnp.allclose(out, ref, atol=5e-2, rtol=5e-2), "mismatch vs JAX reference"

    print("KERNEL_OK")
</pallas_src>

<mosaic_0001>
module attributes {stable_mosaic.version = 11 : i64} {
  func.func @_conv_bn_relu_kernel(%arg0: i32, %arg1: memref<64x108xbf16, #tpu.memory_space<vmem>>, %arg2: memref<108x8xbf16, #tpu.memory_space<vmem>>, %arg3: memref<1x8xf32, #tpu.memory_space<vmem>>, %arg4: memref<64x8xf32, #tpu.memory_space<vmem>>) attributes {dimension_semantics = [#tpu.dimension_semantics<parallel>], iteration_bounds = array<i64: 1>, scalar_prefetch = 0 : i64, scratch_operands = 0 : i64, tpu.core_type = #tpu.core_type<tc>, window_params = [{transform_indices = @transform_0, window_bounds = array<i64: 64, 108>}, {pipeline_mode = #tpu.pipeline_mode<synchronous>, transform_indices = @transform_1, window_bounds = array<i64: 108, 8>}, {pipeline_mode = #tpu.pipeline_mode<synchronous>, transform_indices = @transform_2, window_bounds = array<i64: 1, 8>}, {transform_indices = @transform_3, window_bounds = array<i64: 64, 8>}]} {
    %c0 = arith.constant 0 : index
    %c0_0 = arith.constant 0 : index
    %0 = vector.load %arg1[%c0, %c0_0] : memref<64x108xbf16, #tpu.memory_space<vmem>>, vector<64x108xbf16>
    %c0_1 = arith.constant 0 : index
    %c0_2 = arith.constant 0 : index
    %1 = vector.load %arg2[%c0_1, %c0_2] : memref<108x8xbf16, #tpu.memory_space<vmem>>, vector<108x8xbf16>
    %cst = arith.constant dense<0.000000e+00> : vector<64x8xf32>
    %2 = tpu.matmul %0, %1, %cst {dimension_numbers = #tpu.dot_dimension_numbers<[1], [0], [0], [1], [0, 0, 1, 1], [], []>} : vector<64x108xbf16>, vector<108x8xbf16>, vector<64x8xf32> -> vector<64x8xf32>
    %c0_3 = arith.constant 0 : index
    %c0_4 = arith.constant 0 : index
    %3 = vector.load %arg3[%c0_3, %c0_4] : memref<1x8xf32, #tpu.memory_space<vmem>>, vector<1x8xf32>
    %4 = vector.broadcast %3 : vector<1x8xf32> to vector<64x8xf32>
    %5 = arith.addf %2, %4 : vector<64x8xf32>
    %cst_5 = arith.constant 0.000000e+00 : f32
    %6 = vector.broadcast %cst_5 : f32 to vector<64x8xf32>
    %7 = arith.maximumf %5, %6 : vector<64x8xf32>
    %c0_6 = arith.constant 0 : index
    %c0_7 = arith.constant 0 : index
    %8 = vector.load %arg4[%c0_6, %c0_7] : memref<64x8xf32, #tpu.memory_space<vmem>>, vector<64x8xf32>
    tpu.vector_store %arg4[%c0_6, %c0_7], %7 {strides = array<i32>} : memref<64x8xf32, #tpu.memory_space<vmem>>, vector<64x8xf32>,
    return
  }
  func.func @transform_0(%arg0: i32) -> (i32, i32) {
    %c0_i32 = arith.constant 0 : i32
    %c0_i32_0 = arith.constant 0 : i32
    return %arg0, %c0_i32 : i32, i32
  }
  func.func @transform_1(%arg0: i32) -> (i32, i32) {
    %c0_i32 = arith.constant 0 : i32
    %c0_i32_0 = arith.constant 0 : i32
    %c0_i32_1 = arith.constant 0 : i32
    return %c0_i32, %c0_i32_0 : i32, i32
  }
  func.func @transform_2(%arg0: i32) -> (i32, i32) {
    %c0_i32 = arith.constant 0 : i32
    %c0_i32_0 = arith.constant 0 : i32
    %c0_i32_1 = arith.constant 0 : i32
    return %c0_i32, %c0_i32_0 : i32, i32
  }
  func.func @transform_3(%arg0: i32) -> (i32, i32) {
    %c0_i32 = arith.constant 0 : i32
    %c0_i32_0 = arith.constant 0 : i32
    return %arg0, %c0_i32 : i32, i32
  }
}

</mosaic_0001>

<bundles_post_ra>
// kernel: tpu_custom_call.1
= control target key start
LH: loop header
LB: loop body
LE: loop exit
PB: predicated region body
PF: predicated region fallthrough
CT: control target
= control target key end

     0   :  { %vm105_vm0 = vcmask 883712   ;;  %vm118_vm1 = vcmask 1045504   ;;  %vm195_vm2 = vcmask 64512   ;;  %s376_s1 = inlined_call_operand.vmem [shape: bf16[108,8], index: 1, kind: input, shape index: {}]   ;;  %s377_s0 = inlined_call_operand.vmem [shape: bf16[64,108], index: 0, kind: input, shape index: {}]   ;;  %s378_s2 = inlined_call_operand.vmem [shape: f32[1,8], index: 2, kind: input, shape index: {}]   ;;  %s379_s3 = inlined_call_operand.vmem [shape: f32[64,8], index: 3, kind: output, shape index: {}]  }
   0x1   :  { %v273_v0 = vld [vmem:[%s376_s1] sm:$0xff]   ;;  %v274_v1 = vld [vmem:[%s376_s1 + $0x8] sm:$0xff]   ;;  %v275_v2 = vld [vmem:[%s376_s1 + $0x10] sm:$0xff]  }
   0x2   :  { %235 = vmatprep.subr.bf16.mxu0 %v273_v0  ;;  %257 = vmatprep.subr.bf16.mxu1 %v273_v0  ;;  %v276_v3 = vld [vmem:[%s376_s1 + $0x18] sm:$0xff]   ;;  %v280_v4 = vld [vmem:[%s377_s0] sm:$0xff]   ;;  %v281_v5 = vld [vmem:[%s377_s0 + $0x10] sm:$0xff]  }
   0x3   :  { %236 = vmatpush3.bf16.msra.mxu0 %v273_v0  ;;  %264 = vmatpush3.bf16.msra.mxu1 %v273_v0  ;;  %v277_v6 = vld [vmem:[%s376_s1 + $0x20] sm:$0xff]   ;;  %v278_v7 = vld [vmem:[%s376_s1 + $0x28] sm:$0xff]   ;;  %v279_v8 = vld [vmem:[%s376_s1 + $0x30] sm:$0x3f]  }
   0x4   :  { %237 = vmatprep.subr.bf16.mxu0 %v274_v1  ;;  %258 = vmatprep.subr.bf16.mxu1 %v274_v1  ;;  %v120_v9 = vsel %vm118_vm1, %v279_v8, 0  ;;  %v282_v10 = vld [vmem:[%s377_s0 + $0x8] sm:$0xff]   ;;  %v283_v11 = vld [vmem:[%s377_s0 + $0x18] sm:$0xff]   ;;  %v208_v12 = vld [vmem:[%s378_s2] ss:$0 sm:$0xff] }
   0x5   :  { %249 = vmatprep.mubr.msk.bf16.mxu0 %vm105_vm0, %v280_v4  ;;  %253 = vmatprep.mubr.msk.bf16.mxu1 %vm105_vm0, %v281_v5 }
   0x7   :  { %238 = vmatpush3.bf16.msra.mxu0 %v274_v1  ;;  %265 = vmatpush3.bf16.msra.mxu1 %v274_v1 }
   0x8   :  { %239 = vmatprep.subr.bf16.mxu0 %v275_v2  ;;  %259 = vmatprep.subr.bf16.mxu1 %v275_v2 }
   0xb   :  { %240 = vmatpush3.bf16.msra.mxu0 %v275_v2  ;;  %266 = vmatpush3.bf16.msra.mxu1 %v275_v2 }
   0xc   :  { %241 = vmatprep.subr.bf16.mxu0 %v276_v3  ;;  %260 = vmatprep.subr.bf16.mxu1 %v276_v3 }
   0xf   :  { %242 = vmatpush3.bf16.msra.mxu0 %v276_v3  ;;  %267 = vmatpush3.bf16.msra.mxu1 %v276_v3 }
  0x10   :  { %243 = vmatprep.subr.bf16.mxu0 %v277_v6  ;;  %261 = vmatprep.subr.bf16.mxu1 %v277_v6 }
  0x13   :  { %244 = vmatpush3.bf16.msra.mxu0 %v277_v6  ;;  %268 = vmatpush3.bf16.msra.mxu1 %v277_v6 }
  0x14   :  { %245 = vmatprep.subr.bf16.mxu0 %v278_v7  ;;  %262 = vmatprep.subr.bf16.mxu1 %v278_v7 }
  0x17   :  { %246 = vmatpush3.bf16.msra.mxu0 %v278_v7  ;;  %269 = vmatpush3.bf16.msra.mxu1 %v278_v7 }
  0x18   :  { %271 = vmatprep.subr.msk.bf16.mxu0 %vm118_vm1, %v279_v8  ;;  %272 = vmatprep.subr.msk.bf16.mxu1 %vm118_vm1, %v279_v8 }
  0x1b   :  { %248 = vmatpush3.bf16.msra.mxu0 %v120_v9  ;;  %270 = vmatpush3.bf16.msra.mxu1 %v120_v9 }
  0x1e   :  { %250 = vmatmul.mubr.msk.bf16.vlgmr.msra.gmra.mrb[0].mxu0 %vm105_vm0, %v282_v10  ;;  %254 = vmatmul.mubr.msk.bf16.vlgmr.msra.gmra.mrb[0].mxu1 %vm105_vm0, %v283_v11 }
  0xf1   :  { %v251_v13 = vpop.f32.mrb[0].mxu0  ;;  %v255_v14 = vpop.f32.mrb[0].mxu1 }
  0xf2   :  { %v165_v15 = vadd.f32 %v251_v13, %v208_v12  ;;  %v181_v16 = vadd.f32 %v255_v14, %v208_v12  ;;  %v156_v17 = vpop.f32.mrb[1].mxu0  ;;  %v172_v18 = vpop.f32.mrb[1].mxu1 }
  0xf3   :  { %v157_v19 = vadd.f32 %v208_v12, %v156_v17  ;;  %v173_v20 = vadd.f32 %v208_v12, %v172_v18  ;;  %v252_v21 = vpop.f32.mrb[2].mxu0  ;;  %v256_v22 = vpop.f32.mrb[2].mxu1 }
  0xf4   :  { %v189_v23 = vmax.f32 %v165_v15, 0.0  ;;  %v193_v24 = vmax.f32 %v181_v16, 0.0  ;;  %v168_v25 = vadd.f32 %v252_v21, %v208_v12  ;;  %v184_v26 = vadd.f32 %v256_v22, %v208_v12  ;;  %v159_v27 = vpop.f32.mrb[3].mxu0  ;;  %v175_v28 = vpop.f32.mrb[3].mxu1 }
  0xf5   :  { %v187_v29 = vmax.f32 %v157_v19, 0.0  ;;  %v191_v30 = vmax.f32 %v173_v20, 0.0  ;;  %v160_v31 = vadd.f32 %v208_v12, %v159_v27  ;;  %v176_v32 = vadd.f32 %v208_v12, %v175_v28 }
  0xf6   :  { %198 = vst.msk [vmem:[%s379_s3 + $0x10] sm:$0xff] %vm195_vm2, %v189_v23  ;;  %202 = vst.msk [vmem:[%s379_s3 + $0x30] sm:$0xff] %vm195_vm2, %v193_v24  ;;  %v190_v33 = vmax.f32 %v168_v25, 0.0  ;;  %v194_v34 = vmax.f32 %v184_v26, 0.0 }
  0xf7   :  { %196 = vst.msk [vmem:[%s379_s3] sm:$0xff] %vm195_vm2, %v187_v29  ;;  %200 = vst.msk [vmem:[%s379_s3 + $0x20] sm:$0xff] %vm195_vm2, %v191_v30  ;;  %v188_v35 = vmax.f32 %v160_v31, 0.0  ;;  %v192_v36 = vmax.f32 %v176_v32, 0.0 }
  0xf8   :  { %199 = vst.msk [vmem:[%s379_s3 + $0x18] sm:$0xff] %vm195_vm2, %v190_v33  ;;  %203 = vst.msk [vmem:[%s379_s3 + $0x38] sm:$0xff] %vm195_vm2, %v194_v34 }
  0xf9   :  { %197 = vst.msk [vmem:[%s379_s3 + $0x8] sm:$0xff] %vm195_vm2, %v188_v35  ;;  %201 = vst.msk [vmem:[%s379_s3 + $0x28] sm:$0xff] %vm195_vm2, %v192_v36 }

</bundles_post_ra>
